<compile_context>
chip_gen: v7x
topology: tpu7x:2x2x1
jax: 0.10.0
libtpu: 0.0.40
codegen_flags: <defaults>
</compile_context>

<pallas_src>
import jax
import jax.numpy as jnp
from jax.experimental import pallas as pl
from jax.experimental.pallas import tpu as pltpu


def _round_up(v: int, m: int) -> int:
    return ((v + m - 1) // m) * m


def make_actor_forward(w, b, action_scale, action_bias):
    """Prepare Actor parameters once (out of the per-call hot path) and return
    a jitted forward(x, std, noise) -> (action, None, mean)."""
    obs_dim, act_dim = w.shape

    # Fold the `-K(x)` negation into the parameters (one-time cost):
    #   mean = x @ (-W) + (-b)
    neg_w = (-jnp.asarray(w, jnp.float32))
    # Merge (-b, action_scale, action_bias) into one resident (3, act_dim) slab.
    params = jnp.stack(
        [-jnp.asarray(b, jnp.float32),
         jnp.asarray(action_scale, jnp.float32),
         jnp.asarray(action_bias, jnp.float32)], axis=0)

    def actor_kernel(std_ref, x_ref, n_ref, w_ref, p_ref, act_ref, mean_ref):
        std = std_ref[0, 0]                                   # SMEM scalar
        # mean = x @ (-W) + (-b)      (MXU matmul, fp32 accumulate)
        mean = (jnp.dot(x_ref[...], w_ref[...],
                        preferred_element_type=jnp.float32)
                + p_ref[0:1, :])
        # reparameterized Normal(mean, std) sample -> tanh squash -> rescale
        y_t = jnp.tanh(mean + std * n_ref[...])
        act_ref[...] = (y_t * p_ref[1:2, :] + p_ref[2:3, :]).astype(act_ref.dtype)
        mean_ref[...] = mean.astype(mean_ref.dtype)

    def forward(x, std, noise):
        B = x.shape[0]

        # ---- batch tiling: 8-aligned tiles, pad < 8 rows per tile ----------
        B8 = _round_up(B, 8)
        if B8 <= 512:
            n_tiles, TB = 1, B8          # tiny batch: don't split (overhead)
        else:
            # >= 2 tiles (v7x megacore), each tile <= ~1024 rows to amortize
            # the ~0.35 us per-grid-step overhead.
            n_tiles = max(2, pl.cdiv(B8, 1024))
            TB = _round_up(pl.cdiv(B8, n_tiles), 8)
        Bp = n_tiles * TB

        if Bp != B:
            x_p = jnp.pad(x.astype(jnp.float32), ((0, Bp - B), (0, 0)))
            n_p = jnp.pad(noise.astype(jnp.float32), ((0, Bp - B), (0, 0)))
        else:
            x_p = x.astype(jnp.float32)
            n_p = noise.astype(jnp.float32)

        std_arr = jnp.asarray(std, jnp.float32).reshape(1, 1)

        action_p, mean_p = pl.pallas_call(
            actor_kernel,
            out_shape=(jax.ShapeDtypeStruct((Bp, act_dim), jnp.float32),
                       jax.ShapeDtypeStruct((Bp, act_dim), jnp.float32)),
            grid=(n_tiles,),
            in_specs=[
                # std: runtime scalar in SMEM (no recompile per std value)
                pl.BlockSpec(memory_space=pltpu.MemorySpace.SMEM),
                pl.BlockSpec((TB, obs_dim), lambda i: (i, 0)),   # x tile
                pl.BlockSpec((TB, act_dim), lambda i: (i, 0)),   # eps tile
                pl.BlockSpec((obs_dim, act_dim), lambda i: (0, 0)),  # -W (resident)
                pl.BlockSpec((3, act_dim), lambda i: (0, 0)),    # (-b, scale, bias)
            ],
            out_specs=(pl.BlockSpec((TB, act_dim), lambda i: (i, 0)),   # action
                       pl.BlockSpec((TB, act_dim), lambda i: (i, 0))),  # mean
            compiler_params=pltpu.CompilerParams(
                dimension_semantics=("parallel",)),
        )(std_arr, x_p, n_p, neg_w, params)

        if Bp != B:
            action_p = action_p[:B]
            mean_p = mean_p[:B]
        return action_p, None, mean_p

    return jax.jit(forward)


if __name__ == "__main__":
    # Small synthetic env: obs_dim=24, act_dim=8
    obs_dim, act_dim = 24, 8
    batch = 8
    std = 0.2

    key = jax.random.PRNGKey(0)
    kx, kw, kb, kn = jax.random.split(key, 4)

    x = jax.random.normal(kx, (batch, obs_dim), dtype=jnp.float32)

    # nn.Linear-style init: U(-1/sqrt(fan_in), 1/sqrt(fan_in))
    bound = obs_dim ** -0.5
    w = jax.random.uniform(kw, (obs_dim, act_dim), dtype=jnp.float32,
                           minval=-bound, maxval=bound)
    b = jax.random.uniform(kb, (act_dim,), dtype=jnp.float32,
                           minval=-bound, maxval=bound)

    # action space bounds -> scale / bias as in the PyTorch module
    high = jnp.linspace(0.5, 2.0, act_dim, dtype=jnp.float32)
    low = -jnp.linspace(1.0, 1.5, act_dim, dtype=jnp.float32)
    action_scale = (high - low) / 2.0
    action_bias = (high + low) / 2.0

    # deterministic standard-normal sample for Normal(mean, std).sample()
    noise = jax.random.normal(kn, (batch, act_dim), dtype=jnp.float32)

    forward = make_actor_forward(w, b, action_scale, action_bias)
    action, _, mean = forward(x, std, noise)
    jax.block_until_ready((action, mean))

    # Pure-JAX reference (same semantics as the PyTorch forward).
    mean_ref = -(x @ w + b)
    action_ref = jnp.tanh(mean_ref + std * noise) * action_scale + action_bias

    assert action.shape == (batch, act_dim)
    assert mean.shape == (batch, act_dim)
    assert jnp.allclose(mean, mean_ref, atol=1e-5, rtol=1e-5)
    assert jnp.allclose(action, action_ref, atol=1e-5, rtol=1e-5)

    print("KERNEL_OK")
</pallas_src>

<mosaic_0001>
module attributes {stable_mosaic.version = 11 : i64} {
  func.func @actor_kernel(%arg0: i32, %arg1: memref<1x1xf32, #tpu.memory_space<smem>>, %arg2: memref<8x24xf32, #tpu.memory_space<vmem>>, %arg3: memref<8x8xf32, #tpu.memory_space<vmem>>, %arg4: memref<24x8xf32, #tpu.memory_space<vmem>>, %arg5: memref<3x8xf32, #tpu.memory_space<vmem>>, %arg6: memref<8x8xf32, #tpu.memory_space<vmem>>, %arg7: memref<8x8xf32, #tpu.memory_space<vmem>>) attributes {dimension_semantics = [#tpu.dimension_semantics<parallel>], iteration_bounds = array<i64: 1>, scalar_prefetch = 0 : i64, scratch_operands = 0 : i64, tpu.core_type = #tpu.core_type<tc>, window_params = [{transform_indices = @transform_0, window_bounds = array<i64: 1, 1>}, {transform_indices = @transform_1, window_bounds = array<i64: 8, 24>}, {transform_indices = @transform_2, window_bounds = array<i64: 8, 8>}, {pipeline_mode = #tpu.pipeline_mode<synchronous>, transform_indices = @transform_3, window_bounds = array<i64: 24, 8>}, {pipeline_mode = #tpu.pipeline_mode<synchronous>, transform_indices = @transform_4, window_bounds = array<i64: 3, 8>}, {transform_indices = @transform_5, window_bounds = array<i64: 8, 8>}, {transform_indices = @transform_6, window_bounds = array<i64: 8, 8>}]} {
    %c0 = arith.constant 0 : index
    %c0_0 = arith.constant 0 : index
    %0 = memref.load %arg1[%c0, %c0_0] : memref<1x1xf32, #tpu.memory_space<smem>>
    %c0_1 = arith.constant 0 : index
    %c0_2 = arith.constant 0 : index
    %1 = vector.load %arg2[%c0_1, %c0_2] : memref<8x24xf32, #tpu.memory_space<vmem>>, vector<8x24xf32>
    %c0_3 = arith.constant 0 : index
    %c0_4 = arith.constant 0 : index
    %2 = vector.load %arg4[%c0_3, %c0_4] : memref<24x8xf32, #tpu.memory_space<vmem>>, vector<24x8xf32>
    %cst = arith.constant dense<0.000000e+00> : vector<8x8xf32>
    %3 = tpu.matmul %1, %2, %cst {dimension_numbers = #tpu.dot_dimension_numbers<[1], [0], [0], [1], [0, 0, 1, 1], [], []>} : vector<8x24xf32>, vector<24x8xf32>, vector<8x8xf32> -> vector<8x8xf32>
    %c0_5 = arith.constant 0 : index
    %c0_6 = arith.constant 0 : index
    %4 = vector.load %arg5[%c0_5, %c0_6] : memref<3x8xf32, #tpu.memory_space<vmem>>, vector<1x8xf32>
    %5 = vector.broadcast %4 : vector<1x8xf32> to vector<8x8xf32>
    %6 = arith.addf %3, %5 : vector<8x8xf32>
    %c0_7 = arith.constant 0 : index
    %c0_8 = arith.constant 0 : index
    %7 = vector.load %arg3[%c0_7, %c0_8] : memref<8x8xf32, #tpu.memory_space<vmem>>, vector<8x8xf32>
    %8 = vector.broadcast %0 : f32 to vector<8x8xf32>
    %9 = arith.mulf %8, %7 : vector<8x8xf32>
    %10 = arith.addf %6, %9 : vector<8x8xf32>
    %11 = math.tanh %10 : vector<8x8xf32>
    %c1 = arith.constant 1 : index
    %c0_9 = arith.constant 0 : index
    %12 = vector.load %arg5[%c1, %c0_9] : memref<3x8xf32, #tpu.memory_space<vmem>>, vector<1x8xf32>
    %13 = vector.broadcast %12 : vector<1x8xf32> to vector<8x8xf32>
    %14 = arith.mulf %11, %13 : vector<8x8xf32>
    %c2 = arith.constant 2 : index
    %c0_10 = arith.constant 0 : index
    %15 = vector.load %arg5[%c2, %c0_10] : memref<3x8xf32, #tpu.memory_space<vmem>>, vector<1x8xf32>
    %16 = vector.broadcast %15 : vector<1x8xf32> to vector<8x8xf32>
    %17 = arith.addf %14, %16 : vector<8x8xf32>
    %c0_11 = arith.constant 0 : index
    %c0_12 = arith.constant 0 : index
    %18 = vector.load %arg6[%c0_11, %c0_12] : memref<8x8xf32, #tpu.memory_space<vmem>>, vector<8x8xf32>
    tpu.vector_store %arg6[%c0_11, %c0_12], %17 {strides = array<i32>} : memref<8x8xf32, #tpu.memory_space<vmem>>, vector<8x8xf32>,
    %c0_13 = arith.constant 0 : index
    %c0_14 = arith.constant 0 : index
    %19 = vector.load %arg7[%c0_13, %c0_14] : memref<8x8xf32, #tpu.memory_space<vmem>>, vector<8x8xf32>
    tpu.vector_store %arg7[%c0_13, %c0_14], %6 {strides = array<i32>} : memref<8x8xf32, #tpu.memory_space<vmem>>, vector<8x8xf32>,
    return
  }
  func.func @transform_0(%arg0: i32) -> (i32, i32) {
    %c0_i32 = arith.constant 0 : i32
    %c0_i32_0 = arith.constant 0 : i32
    %c0_i32_1 = arith.constant 0 : i32
    return %c0_i32, %c0_i32_0 : i32, i32
  }
  func.func @transform_1(%arg0: i32) -> (i32, i32) {
    %c0_i32 = arith.constant 0 : i32
    %c0_i32_0 = arith.constant 0 : i32
    return %arg0, %c0_i32 : i32, i32
  }
  func.func @transform_2(%arg0: i32) -> (i32, i32) {
    %c0_i32 = arith.constant 0 : i32
    %c0_i32_0 = arith.constant 0 : i32
    return %arg0, %c0_i32 : i32, i32
  }
  func.func @transform_3(%arg0: i32) -> (i32, i32) {
    %c0_i32 = arith.constant 0 : i32
    %c0_i32_0 = arith.constant 0 : i32
    %c0_i32_1 = arith.constant 0 : i32
    return %c0_i32, %c0_i32_0 : i32, i32
  }
  func.func @transform_4(%arg0: i32) -> (i32, i32) {
    %c0_i32 = arith.constant 0 : i32
    %c0_i32_0 = arith.constant 0 : i32
    %c0_i32_1 = arith.constant 0 : i32
    return %c0_i32, %c0_i32_0 : i32, i32
  }
  func.func @transform_5(%arg0: i32) -> (i32, i32) {
    %c0_i32 = arith.constant 0 : i32
    %c0_i32_0 = arith.constant 0 : i32
    return %arg0, %c0_i32 : i32, i32
  }
  func.func @transform_6(%arg0: i32) -> (i32, i32) {
    %c0_i32 = arith.constant 0 : i32
    %c0_i32_0 = arith.constant 0 : i32
    return %arg0, %c0_i32 : i32, i32
  }
}

</mosaic_0001>

<bundles_post_ra>
// kernel: forward.1
= control target key start
LH: loop header
LB: loop body
LE: loop exit
PB: predicated region body
PF: predicated region fallthrough
CT: control target
= control target key end

     0   :  { %13 = vsyncpa [#allocation4], 0  ;;  %s428_s0 = inlined_call_operand.<no memory space> [shape: f32[1,1], index: 0, kind: input, shape index: {}]   ;;  %s429_s1 = inlined_call_operand.hbm [shape: f32[8,24], index: 1, kind: input, shape index: {}]   ;;  %s430_s2 = inlined_call_operand.vmem [shape: f32[8,8], index: 2, kind: input, shape index: {}]   ;;  %s431_s3 = inlined_call_operand.hbm [shape: f32[24,8], index: 3, kind: input, shape index: {}]   ;;  %s432_s4 = inlined_call_operand.vmem [shape: f32[3,8], index: 4, kind: input, shape index: {}]   ;;  %s433_s5 = inlined_call_operand.hbm [shape: f32[8,8], index: 5, kind: output, shape index: {0}]   ;;  %s434_s6 = inlined_call_operand.hbm [shape: f32[8,8], index: 6, kind: output, shape index: {1}]  }
   0x1   :  { %14 = vsyncpa [#allocation7], 0 }
   0x2   :  { %15 = vsyncpa [#allocation5], 0 }
   0x3   :  { %16 = vsyncpa [#allocation10], 0  ;;  %s312_s21 = smov [#allocation3]   ;;  %s313_s23 = smov [#allocation6]  }
   0x4   :  { %s25_s22 = sshll.u32 %s312_s21, 4  ;;  %s36_s24 = sshll.u32 %s313_s23, 4  ;;  %s26_s22 = int_to_ptr.vmem [resolvable:$true] %s25_s22  ;;  %s356_s24 = int_to_ptr.vmem [resolvable:$true] %s36_s24 }
   0x5   :  { %s216_s27 = scalar_lea.hbm %s429_s1, 128 }
   0x6   :  { %p217_p0 = scmp.ne.s32.totalorder %s429_s1, %s216_s27  ;;  %p220_p1 = scmp.lt.u32.totalorder %s216_s27, %s429_s1 }
   0x8   :  { %p222_p2 = pnand %p220_p1, %p217_p0 }
   0xa   :  { %225 = shalt.err (!%p222_p2)
}
   0xb   :  { %s226_s8 = scalar_lea.vmem %s26_s22, 128  ;;  %p231_p4 = scmp.lt.s32.totalorder %s26_s22, %s26_s22 }
   0xc   :  { %p227_p3 = scmp.ne.s32.totalorder %s26_s22, %s226_s8  ;;  %p232_p5 = scmp.lt.s32.totalorder %s226_s8, %s226_s8 }
   0xe   :  { %p233_p6 = por %p232_p5, %p231_p4 }
  0x10   :  { %p234_p7 = pnand %p233_p6, %p227_p3 }
  0x12   :  { %237 = shalt.err (!%p234_p7)
}
  0x13   :  { %28 = dma.hbm_to_vmem [thread:$0]  %s429_s1, 128, %s26_s22, [#allocation4]  }
  0x14   :  { %s238_s13 = scalar_lea.hbm %s431_s3, 384 }
  0x15   :  { %p239_p8 = scmp.ne.s32.totalorder %s431_s3, %s238_s13  ;;  %p242_p9 = scmp.lt.u32.totalorder %s238_s13, %s431_s3 }
  0x17   :  { %p244_p10 = pnand %p242_p9, %p239_p8 }
  0x19   :  { %247 = shalt.err (!%p244_p10)
}
  0x1a   :  { %s248_s18 = scalar_lea.vmem %s356_s24, 384  ;;  %p253_p12 = scmp.lt.s32.totalorder %s356_s24, %s356_s24 }
  0x1b   :  { %p249_p11 = scmp.ne.s32.totalorder %s356_s24, %s248_s18  ;;  %p254_p13 = scmp.lt.s32.totalorder %s248_s18, %s248_s18 }
  0x1d   :  { %p255_p0 = por %p254_p13, %p253_p12 }
  0x1f   :  { %p256_p1 = pnand %p255_p0, %p249_p11 }
  0x21   :  { %259 = shalt.err (!%p256_p1)
}
  0x22   :  { %s314_s1 = smov 128   ;;  %s315_s19 = smov 8  }
  0x23   :  { %42 = dma.hbm_to_vmem [thread:$0]  %s431_s3, 384, %s356_s24, [#allocation7], %s314_s1, %s314_s1, %s315_s19  }
  0x24   :  { %304 = dma.done.wait [#allocation4], 128  }
  0x25   :  { %305 = vsyncadd [#allocation4], 4294967168 }
  0x26   :  { %306 = dma.done.wait [#allocation7], 384  }
  0x27   :  { %307 = vsyncadd [#allocation7], 4294966912  ;;  %v316_v0 = vmov 0.0|0.0   ;;  %vm317_vm0 = vmmov 0   ;;  %v318_v1 = vmov 0.0   ;;  %v53_v2 = vld [vmem:[#allocation6] sm:$0xff]  ;;  %v136_v8 = vstv %s428_s0 }
  0x28   :  { %202 = vmatprep.subr.bf16.mxu0 %v316_v0  ;;  %199 = vmatprep.mubr.msk.f32.mxu0 %vm317_vm0, %v318_v1  ;;  %v54_v3 = vld [vmem:[#allocation6 + $0x8] sm:$0xff]  ;;  %v55_v5 = vld [vmem:[#allocation6 + $0x10] sm:$0xff]  ;;  %v52_v6 = vld [vmem:[#allocation3] sm:$0xff]  ;;  %vm61_vm1 = vcmask 195584   ;;  %s319_s27 = smov [#allocation9]   ;;  %vm152_vm2 = vcmask 64512  }
  0x29   :  { %v203_v4 = vpack.c.bf16 %v54_v3, %v53_v2  ;;  %v135_v7 = vld [vmem:[%s430_s2] sm:$0xff]  ;;  %s171_s28 = sshll.u32 %s319_s27, 4  ;;  %s172_s28 = int_to_ptr.vmem [resolvable:$true] %s171_s28 }
  0x2a   :  { %v185_v9 = vld [vmem:[%s432_s4] ss:$0 sm:$0xff]  ;;  %v137_v10 = vmul.f32 %v136_v8, %v135_v7  ;;  %s260_s2 = scalar_lea.vmem %s172_s28, 128  ;;  %p265_p3 = scmp.lt.s32.totalorder %s172_s28, %s172_s28 }
  0x2b   :  { %204 = vmatpush3.bf16.msra.mxu0 %v203_v4  ;;  %p261_p2 = scmp.ne.s32.totalorder %s172_s28, %s260_s2  ;;  %p266_p4 = scmp.lt.s32.totalorder %s260_s2, %s260_s2 }
  0x2c   :  { %197 = vmatprep.subr.mxu0 %v318_v1 }
  0x2d   :  { %p267_p5 = por %p266_p4, %p265_p3 }
  0x2f   :  { %198 = vmatpush3.msra.mxu0 %v55_v5  ;;  %p268_p6 = pnand %p267_p5, %p261_p2 }
  0x30   :  { %200 = vmatmul.mubr.msk.f32.vlgmr.msra.gmra.mrb[0].mxu0 %vm61_vm1, %v52_v6 }
 0x103   :  { %v131_v11 = vpop.f32.mrb[0].mxu0 }
 0x104   :  { %v132_v12 = vadd.f32 %v185_v9, %v131_v11  ;;  %v201_v13 = vpop.f32.mrb[1].mxu0 }
 0x106   :  { %v138_v14 = vadd.f32 %v137_v10, %v132_v12  ;;  %154 = vst.msk [vmem:[#allocation9] sm:$0xff] %vm152_vm2, %v132_v12 }
 0x107   :  { %271 = shalt.err (!%p268_p6)
}
 0x108   :  { %s272_s30 = scalar_lea.hbm %s434_s6, 128 }
 0x109   :  { %p273_p7 = scmp.ne.s32.totalorder %s434_s6, %s272_s30  ;;  %p276_p8 = scmp.lt.u32.totalorder %s272_s30, %s434_s6 }
 0x10b   :  { %p278_p9 = pnand %p276_p8, %p273_p7 }
 0x10d   :  { %281 = shalt.err (!%p278_p9)
}
 0x10e   :  { %174 = dma.vmem_to_hbm [thread:$0]  %s172_s28, 128, %s434_s6, [#allocation10]   ;;  %214 = vtanh.f32 %v138_v14  ;;  %v187_v15 = vld [vmem:[%s432_s4 + $0x1] ss:$0 sm:$0xff]  ;;  %v188_v17 = vld [vmem:[%s432_s4 + $0x2] ss:$0 sm:$0xff] }
 0x10f   :  { %s320_s17 = smov [#allocation8]  }
 0x110   :  { %s161_s18 = sshll.u32 %s320_s17, 4  ;;  %s162_s18 = int_to_ptr.vmem [resolvable:$true] %s161_s18 }
 0x111   :  { %s282_s1 = scalar_lea.vmem %s162_s18, 128  ;;  %p287_p11 = scmp.lt.s32.totalorder %s162_s18, %s162_s18 }
 0x112   :  { %p283_p10 = scmp.ne.s32.totalorder %s162_s18, %s282_s1  ;;  %p288_p12 = scmp.lt.s32.totalorder %s282_s1, %s282_s1 }
 0x114   :  { %p289_p13 = por %p288_p12, %p287_p11 }
 0x116   :  { %p290_p0 = pnand %p289_p13, %p283_p10 }
 0x118   :  { %v215_v16 = vpop.eup %214 }
 0x119   :  { %v145_v18 = vmul.f32 %v215_v16, %v187_v15 }
 0x11b   :  { %v151_v19 = vadd.f32 %v188_v17, %v145_v18 }
 0x11d   :  { %153 = vst.msk [vmem:[#allocation8] sm:$0xff] %vm152_vm2, %v151_v19 }
 0x11e   :  { %293 = shalt.err (!%p290_p0)
}
 0x11f   :  { %s294_s20 = scalar_lea.hbm %s433_s5, 128 }
 0x120   :  { %p295_p1 = scmp.ne.s32.totalorder %s433_s5, %s294_s20  ;;  %p298_p2 = scmp.lt.u32.totalorder %s294_s20, %s433_s5 }
 0x122   :  { %p300_p3 = pnand %p298_p2, %p295_p1 }
 0x124   :  { %303 = shalt.err (!%p300_p3)
}
 0x125   :  { %164 = dma.vmem_to_hbm [thread:$0]  %s162_s18, 128, %s433_s5, [#allocation5]  }
 0x126   :  { %308 = dma.done.wait [#allocation5], 128  }
 0x127   :  { %309 = vsyncadd [#allocation5], 4294967168 }
 0x128   :  { %310 = dma.done.wait [#allocation10], 128  }
 0x129   :  { %311 = vsyncadd [#allocation10], 4294967168 }
 0x12a   :  { %181 = vsyncpa [#allocation4], 1 }
 0x12b   :  { %182 = vsyncpa [#allocation7], 1 }
 0x12c   :  { %183 = vsyncpa [#allocation5], 1 }
 0x12d   :  { %184 = vsyncpa [#allocation10], 1 }

</bundles_post_ra>
